<compile_context>
chip_gen: v7x
topology: tpu7x:2x2x1
jax: 0.10.0
libtpu: 0.0.40
codegen_flags: <defaults>
</compile_context>

<pallas_src>
import functools

import jax
import jax.numpy as jnp
from jax.experimental import pallas as pl
from jax.experimental.pallas import tpu as pltpu


# ----------------------------- sizing helpers -----------------------------
def _vmem_budget_bytes():
    """~3/4 of physical VMEM (headroom for compiler scratch / output buffers).

    Falls back to a 64 MiB assumption (v7x per-core size) if the query is
    unavailable, so we never oversubscribe the smallest part.
    """
    try:
        cap = int(pltpu.get_tpu_info().vmem_capacity_bytes)
    except Exception:
        cap = 64 * 2**20
    return (cap * 3) // 4


def _row_tile_cap(n):
    """Row-tile cap: bigger tiles on 128 MiB parts (v5e/v6e), smaller on v7x;
    also keep the double-buffered int8 adj row tile within ~1/4 of the budget."""
    budget = _vmem_budget_bytes()
    big = 512 if budget >= 80 * 2**20 else 256
    by_adj = max(8, (budget // 4) // max(1, 2 * n))
    return max(8, min(big, (by_adj // 8) * 8))


def _pick_row_tile(n, cap):
    """Largest divisor of n <= cap giving >= 2 grid steps; prefers multiples of
    16 (bf16-friendly sublane tiling) and an even step count (v7x has 2 TCs)."""
    for align in (16, 8):
        cands = [t for t in range(min(cap, n), align - 1, -1)
                 if t % align == 0 and n % t == 0 and n // t >= 2]
        if cands:
            for t in cands:
                if (n // t) % 2 == 0:
                    return t
            return cands[0]
    return n  # tiny/awkward n: single tile


# --------------- projection kernel: xp = x @ W (bf16) ; s = x @ (W A) ---------------
def _project_kernel(x_ref, w_ref, wa_ref, xp_ref, s_ref):
    x = x_ref[...]
    # Two independent dots from x (attention vectors pre-folded into WA = W @ A
    # in the wrapper) — no serial xp -> s dependency, no tiny K=HF matmul.
    xp = jnp.dot(x, w_ref[...], preferred_element_type=jnp.float32)
    xp_ref[...] = xp.astype(xp_ref.dtype)          # bf16 resident aggregation operand
    s_ref[...] = jnp.dot(x, wa_ref[...], preferred_element_type=jnp.float32)


def _gat_project(x, w, wa, *, row_tile):
    n, f_in = x.shape
    hf = w.shape[1]
    two_h = wa.shape[1]
    return pl.pallas_call(
        _project_kernel,
        out_shape=(jax.ShapeDtypeStruct((n, hf), jnp.bfloat16),
                   jax.ShapeDtypeStruct((n, two_h), jnp.float32)),
        grid=(n // row_tile,),
        in_specs=[
            pl.BlockSpec((row_tile, f_in), lambda i: (i, 0)),
            pl.BlockSpec((f_in, hf), lambda i: (0, 0)),      # W resident
            pl.BlockSpec((f_in, two_h), lambda i: (0, 0)),   # WA resident
        ],
        out_specs=(pl.BlockSpec((row_tile, hf), lambda i: (i, 0)),
                   pl.BlockSpec((row_tile, two_h), lambda i: (i, 0))),
        compiler_params=pltpu.CompilerParams(
            dimension_semantics=("parallel",)),
    )(x, w, wa)


# ----------- attention kernel: masked softmax + aggregation per dst-row tile -----------
def _gat_attention_kernel(adj_ref, xp_ref, ssrc_ref, sdst_ref, bias_ref, out_ref,
                          *, heads, f_out, concat, apply_elu, negative_slope=0.2):
    # Additive mask bias: one int8 compare + select per tile (not per head);
    # per-head masking becomes a plain f32 add on the hot [TM, N] tensor.
    mask_bias = jnp.where(adj_ref[...] > 0,
                          jnp.float32(0.0), jnp.float32(-1e30))     # [TM, N]

    head_outs = []
    for h in range(heads):                                          # unrolled; heads small
        # e[i, j] = s_dst[i, h] + s_src[h, j]   (s_src transposed in the wrapper)
        e = sdst_ref[:, h:h + 1] + ssrc_ref[h:h + 1, :]             # [TM, N]
        e = jnp.maximum(e, negative_slope * e)                      # LeakyReLU (slope < 1)
        e = e + mask_bias
        m = jnp.max(e, axis=1, keepdims=True)
        p = jnp.exp(e - m)                                          # masked lanes underflow to 0
        inv = pl.reciprocal(jnp.sum(p, axis=1, keepdims=True), approx=True)
        xh = xp_ref[:, h * f_out:(h + 1) * f_out]                   # [N, F_out] bf16
        # Normalize AFTER the aggregation matmul: [TM, F_out] multiply instead
        # of scaling the whole [TM, N] weight matrix.  bf16 operands, f32 accum.
        head_outs.append(
            jnp.dot(p.astype(xh.dtype), xh, preferred_element_type=jnp.float32) * inv)

    if concat:
        out = jnp.concatenate(head_outs, axis=1) + bias_ref[...]
    else:
        acc = head_outs[0]
        for oh in head_outs[1:]:
            acc = acc + oh
        out = acc * jnp.float32(1.0 / heads) + bias_ref[...]
    if apply_elu:
        out = jnp.where(out > 0, out, jnp.expm1(out))
    out_ref[...] = out.astype(out_ref.dtype)                        # one contiguous store


def _gat_attention(adj_i8, xp, s_src_t, s_dst, bias, *, heads, f_out, concat,
                   apply_elu, row_tile):
    n = adj_i8.shape[0]
    hf = xp.shape[1]
    out_dim = heads * f_out if concat else f_out

    # Explicit VMEM budget.  Pallas double-buffers every operand by default, so
    # count the residents twice too; add headroom for the [TM, N] f32
    # temporaries (mask bias / scores / exp weights) kept live per head.
    dbl = 2
    vmem_bytes = (dbl * row_tile * n * adj_i8.dtype.itemsize        # adj tile stream
                  + dbl * n * hf * xp.dtype.itemsize                # xp (bf16, resident)
                  + dbl * heads * n * 4                             # s_src^T resident
                  + dbl * row_tile * heads * 4                      # s_dst tile
                  + dbl * out_dim * 4                               # bias
                  + dbl * row_tile * out_dim * 4                    # out tile
                  + 4 * row_tile * n * 4)                           # elementwise temporaries
    vmem_limit = int(min(_vmem_budget_bytes(), max(16 * 2**20, 2 * vmem_bytes)))

    kernel = functools.partial(_gat_attention_kernel, heads=heads, f_out=f_out,
                               concat=concat, apply_elu=apply_elu)
    return pl.pallas_call(
        kernel,
        out_shape=jax.ShapeDtypeStruct((n, out_dim), jnp.float32),
        grid=(n // row_tile,),
        in_specs=[
            pl.BlockSpec((row_tile, n), lambda i: (i, 0)),       # adj: only O(N^2) stream
            pl.BlockSpec((n, hf), lambda i: (0, 0)),             # xp resident (bf16)
            pl.BlockSpec((heads, n), lambda i: (0, 0)),          # s_src^T resident
            pl.BlockSpec((row_tile, heads), lambda i: (i, 0)),   # s_dst row tile
            pl.BlockSpec(bias.shape, lambda i: (0, 0)),          # bias resident
        ],
        out_specs=pl.BlockSpec((row_tile, out_dim), lambda i: (i, 0)),
        compiler_params=pltpu.CompilerParams(
            dimension_semantics=("parallel",),
            vmem_limit_bytes=vmem_limit),
    )(adj_i8, xp, s_src_t, s_dst, bias)


def gat_layer(x, w, att_src, att_dst, adj_i8, bias, *, heads, f_out, concat, apply_elu):
    n = x.shape[0]
    hf = heads * f_out
    # Block-diagonal attention matrix A: [H*F, 2H];
    #   A[h*F + f, h]     = att_src[h, f]
    #   A[h*F + f, H + h] = att_dst[h, f]
    eye = jnp.eye(heads, dtype=jnp.float32)
    a_src_mat = (att_src[:, :, None] * eye[:, None, :]).reshape(hf, heads)
    a_dst_mat = (att_dst[:, :, None] * eye[:, None, :]).reshape(hf, heads)
    a_mat = jnp.concatenate([a_src_mat, a_dst_mat], axis=1)      # [H*F, 2H]
    wa = w @ a_mat                                               # fold: s = x @ (W A)

    row_tile = _pick_row_tile(n, cap=_row_tile_cap(n))
    xp_bf16, s = _gat_project(x, w, wa, row_tile=row_tile)
    s_src_t = jnp.transpose(s[:, :heads])                        # tiny [H, N], done once
    s_dst = s[:, heads:]                                         # [N, H]
    return _gat_attention(adj_i8, xp_bf16, s_src_t, s_dst, bias, heads=heads,
                          f_out=f_out, concat=concat, apply_elu=apply_elu,
                          row_tile=row_tile)


def gat_forward(x, adj, p):
    """GAT.forward (inference): dropout -> conv1 -> ELU -> dropout -> conv2.

    `adj` should already be int8 (built once by the caller); it is the only
    O(N^2) operand and is reused by both layers.  F.dropout is identity here.
    """
    adj_i8 = adj if adj.dtype == jnp.int8 else adj.astype(jnp.int8)
    h = gat_layer(x, p["w1"], p["a1_src"], p["a1_dst"], adj_i8, p["b1"],
                  heads=p["heads"], f_out=p["hidden"], concat=True, apply_elu=True)
    out = gat_layer(h, p["w2"], p["a2_src"], p["a2_dst"], adj_i8, p["b2"],
                    heads=1, f_out=p["out"], concat=False, apply_elu=False)
    return out


# ------------------------- pure-JAX reference (verification) -------------------------
def _gat_layer_ref(x, w, a_src, a_dst, adj, bias, heads, f_out, concat, apply_elu):
    xp = x @ w
    outs = []
    for h in range(heads):
        xh = xp[:, h * f_out:(h + 1) * f_out]
        s_src = (xh * a_src[h]).sum(1)
        s_dst = (xh * a_dst[h]).sum(1)
        e = s_dst[:, None] + s_src[None, :]
        e = jnp.where(e > 0, e, 0.2 * e)
        e = jnp.where(adj > 0, e, -1e30)
        pm = jnp.exp(e - e.max(1, keepdims=True)) * adj
        alpha = pm / pm.sum(1, keepdims=True)
        outs.append(alpha @ xh)
    out = jnp.concatenate(outs, 1) if concat else sum(outs) / heads
    out = out + bias
    if apply_elu:
        out = jnp.where(out > 0, out, jnp.expm1(out))
    return out


def _gat_forward_ref(x, adj, p):
    h = _gat_layer_ref(x, p["w1"], p["a1_src"], p["a1_dst"], adj, p["b1"],
                       p["heads"], p["hidden"], True, True)
    return _gat_layer_ref(h, p["w2"], p["a2_src"], p["a2_dst"], adj, p["b2"],
                          1, p["out"], False, False)


if __name__ == "__main__":
    N, IN_C, HID_C, OUT_C, HEADS = 512, 16, 8, 4, 4       # N=512 -> 2 dst-row tiles
    NUM_EDGES = 2048

    key = jax.random.PRNGKey(0)
    k_x, k_src, k_dst, k_w1, k_a1, k_w2, k_a2 = jax.random.split(key, 7)

    x = jax.random.normal(k_x, (N, IN_C), jnp.float32)
    edge_index = jnp.stack([
        jax.random.randint(k_src, (NUM_EDGES,), 0, N),
        jax.random.randint(k_dst, (NUM_EDGES,), 0, N),
    ])  # [2, E]: row 0 = source, row 1 = target

    # dense adjacency: adj[target, source] = 1, plus self-loops (self_loop=True)
    adj = jnp.zeros((N, N), jnp.float32).at[edge_index[1], edge_index[0]].set(1.0)
    adj = jnp.maximum(adj, jnp.eye(N, dtype=jnp.float32))
    adj_i8 = adj.astype(jnp.int8)      # built ONCE; 4x smaller O(N^2) mask traffic

    a1 = 0.2 * jax.random.normal(k_a1, (2, HEADS, HID_C), jnp.float32)
    a2 = 0.2 * jax.random.normal(k_a2, (2, 1, OUT_C), jnp.float32)
    params = {
        "heads": HEADS, "hidden": HID_C, "out": OUT_C,
        "w1": 0.3 * jax.random.normal(k_w1, (IN_C, HEADS * HID_C), jnp.float32),
        "a1_src": a1[0], "a1_dst": a1[1],
        "b1": jnp.zeros((1, HEADS * HID_C), jnp.float32),
        "w2": 0.3 * jax.random.normal(k_w2, (HEADS * HID_C, OUT_C), jnp.float32),
        "a2_src": a2[0], "a2_dst": a2[1],
        "b2": jnp.zeros((1, OUT_C), jnp.float32),
    }

    out = jax.block_until_ready(gat_forward(x, adj_i8, params))
    ref = jax.block_until_ready(_gat_forward_ref(x, adj, params))

    assert out.shape == (N, OUT_C)
    # Tolerance reflects bf16 MXU operands (xp and the softmax weights) across
    # two stacked layers plus the EUP approx-reciprocal; scores/softmax stats
    # and all accumulation remain f32.
    assert jnp.allclose(out, ref, atol=5e-2, rtol=5e-2), "mismatch vs JAX reference"
    print("KERNEL_OK")
</pallas_src>

<mosaic_0001>
module attributes {stable_mosaic.version = 11 : i64} {
  func.func @_project_kernel(%arg0: i32, %arg1: memref<256x16xf32, #tpu.memory_space<vmem>>, %arg2: memref<16x32xf32, #tpu.memory_space<vmem>>, %arg3: memref<16x8xf32, #tpu.memory_space<vmem>>, %arg4: memref<256x32xbf16, #tpu.memory_space<vmem>>, %arg5: memref<256x8xf32, #tpu.memory_space<vmem>>) attributes {dimension_semantics = [#tpu.dimension_semantics<parallel>], iteration_bounds = array<i64: 2>, scalar_prefetch = 0 : i64, scratch_operands = 0 : i64, tpu.core_type = #tpu.core_type<tc>, window_params = [{transform_indices = @transform_0, window_bounds = array<i64: 256, 16>}, {pipeline_mode = #tpu.pipeline_mode<synchronous>, transform_indices = @transform_1, window_bounds = array<i64: 16, 32>}, {pipeline_mode = #tpu.pipeline_mode<synchronous>, transform_indices = @transform_2, window_bounds = array<i64: 16, 8>}, {transform_indices = @transform_3, window_bounds = array<i64: 256, 32>}, {transform_indices = @transform_4, window_bounds = array<i64: 256, 8>}]} {
    %c0 = arith.constant 0 : index
    %c0_0 = arith.constant 0 : index
    %0 = vector.load %arg1[%c0, %c0_0] : memref<256x16xf32, #tpu.memory_space<vmem>>, vector<256x16xf32>
    %c0_1 = arith.constant 0 : index
    %c0_2 = arith.constant 0 : index
    %1 = vector.load %arg2[%c0_1, %c0_2] : memref<16x32xf32, #tpu.memory_space<vmem>>, vector<16x32xf32>
    %cst = arith.constant dense<0.000000e+00> : vector<256x32xf32>
    %2 = tpu.matmul %0, %1, %cst {dimension_numbers = #tpu.dot_dimension_numbers<[1], [0], [0], [1], [0, 0, 1, 1], [], []>} : vector<256x16xf32>, vector<16x32xf32>, vector<256x32xf32> -> vector<256x32xf32>
    %3 = arith.truncf %2 : vector<256x32xf32> to vector<256x32xbf16>
    %c0_3 = arith.constant 0 : index
    %c0_4 = arith.constant 0 : index
    %4 = vector.load %arg4[%c0_3, %c0_4] : memref<256x32xbf16, #tpu.memory_space<vmem>>, vector<256x32xbf16>
    tpu.vector_store %arg4[%c0_3, %c0_4], %3 {strides = array<i32>} : memref<256x32xbf16, #tpu.memory_space<vmem>>, vector<256x32xbf16>,
    %c0_5 = arith.constant 0 : index
    %c0_6 = arith.constant 0 : index
    %5 = vector.load %arg3[%c0_5, %c0_6] : memref<16x8xf32, #tpu.memory_space<vmem>>, vector<16x8xf32>
    %cst_7 = arith.constant dense<0.000000e+00> : vector<256x8xf32>
    %6 = tpu.matmul %0, %5, %cst_7 {dimension_numbers = #tpu.dot_dimension_numbers<[1], [0], [0], [1], [0, 0, 1, 1], [], []>} : vector<256x16xf32>, vector<16x8xf32>, vector<256x8xf32> -> vector<256x8xf32>
    %c0_8 = arith.constant 0 : index
    %c0_9 = arith.constant 0 : index
    %7 = vector.load %arg5[%c0_8, %c0_9] : memref<256x8xf32, #tpu.memory_space<vmem>>, vector<256x8xf32>
    tpu.vector_store %arg5[%c0_8, %c0_9], %6 {strides = array<i32>} : memref<256x8xf32, #tpu.memory_space<vmem>>, vector<256x8xf32>,
    return
  }
  func.func @transform_0(%arg0: i32) -> (i32, i32) {
    %c0_i32 = arith.constant 0 : i32
    %c0_i32_0 = arith.constant 0 : i32
    return %arg0, %c0_i32 : i32, i32
  }
  func.func @transform_1(%arg0: i32) -> (i32, i32) {
    %c0_i32 = arith.constant 0 : i32
    %c0_i32_0 = arith.constant 0 : i32
    %c0_i32_1 = arith.constant 0 : i32
    return %c0_i32, %c0_i32_0 : i32, i32
  }
  func.func @transform_2(%arg0: i32) -> (i32, i32) {
    %c0_i32 = arith.constant 0 : i32
    %c0_i32_0 = arith.constant 0 : i32
    %c0_i32_1 = arith.constant 0 : i32
    return %c0_i32, %c0_i32_0 : i32, i32
  }
  func.func @transform_3(%arg0: i32) -> (i32, i32) {
    %c0_i32 = arith.constant 0 : i32
    %c0_i32_0 = arith.constant 0 : i32
    return %arg0, %c0_i32 : i32, i32
  }
  func.func @transform_4(%arg0: i32) -> (i32, i32) {
    %c0_i32 = arith.constant 0 : i32
    %c0_i32_0 = arith.constant 0 : i32
    return %arg0, %c0_i32 : i32, i32
  }
}

</mosaic_0001>

<bundles_post_ra>
// kernel: tpu_custom_call.1
= control target key start
LH: loop header
LB: loop body
LE: loop exit
PB: predicated region body
PF: predicated region fallthrough
CT: control target
= control target key end

     0   :  { %s1444_s15 = smov 0   ;;  %s1714_s0 = inlined_call_operand.vmem [shape: f32[512,16], index: 0, kind: input, shape index: {}]   ;;  %s1715_s1 = inlined_call_operand.vmem [shape: f32[16,32], index: 1, kind: input, shape index: {}]   ;;  %s1716_s2 = inlined_call_operand.vmem [shape: f32[16,8], index: 2, kind: input, shape index: {}]   ;;  %s1717_s3 = inlined_call_operand.vmem [shape: bf16[512,32], index: 3, kind: output, shape index: {0}]   ;;  %s1718_s4 = inlined_call_operand.vmem [shape: f32[512,8], index: 4, kind: output, shape index: {1}]  }
   0x1 LB: > { %s1082_s16 = sadd.s32 4294967295, %s1417_s15   ;;  %p1086_p0 = scmp.ge.s32.totalorder %s1417_s15, 1  ;;  %s1417_s15 = sphi %s1444_s15, %s15_s15  }
   0x2   : > { %p166_p1 = scmp.lt.s32.totalorder %s1417_s15, 3 }
   0x4   : > { %p167_p2 = pnand %p1086_p0, %p166_p1 }
   0x5   : > { %v247_v0 = vld [vmem:[%s1715_s1] sm:$0xff] (!%p167_p2)  ;;  %v248_v1 = vld [vmem:[%s1715_s1 + $0x8] sm:$0xff] (!%p167_p2)  ;;  %s1087_s23 = sshll.u32 (!%p167_p2), %s1082_s16, 5  ;;  %vm249_vm0 = vcmask (!%p167_p2), 130048   ;;  %vm959_vm1 = vcmask (!%p167_p2), 64512   ;;  %vm699_vm2 = vcmask (!%p167_p2), 257024  }
   0x6   : > { %170 = sbr.rel (%p167_p2) target bundleno = 294 (0x126), region = 32  ;;  %v732_v2 = vld [vmem:[%s1716_s2] sm:$0xff] (!%p167_p2)  ;;  %v1395_v3 = vpack.c.bf16 (!%p167_p2), %v248_v1, %v247_v0  ;;  %v733_v4 = vld [vmem:[%s1716_s2 + $0x8] sm:$0xff] (!%p167_p2)  ;;  %p198_p3 = scmp.lt.s32.totalorder (!%p167_p2), %s1087_s23, 63 }
   0x7   : > { %v1399_v5 = vpack.c.bf16 (!%p167_p2), %v733_v4, %v732_v2 }
   0x8   : > { %1396 = vmatprep.subr.bf16.mxu0 (!%p167_p2), %v1395_v3 }
   0x9   : > { %1398 = vmatpush3.bf16.msra.mxu0 (!%p167_p2), %v1395_v3  ;;  %1400 = vmatprep.subr.bf16.mxu1 (!%p167_p2), %v1399_v5 }
   0xa   : > { %1402 = vmatpush3.bf16.msra.mxu1 (!%p167_p2), %v1399_v5 }
   0xd   : > { %s1720_s23 = smov (!%p198_p3, %s1087_s23), 63 }
   0xe   : > { %s1088_s26 = sshll.u32 %s1720_s23, 3  ;;  %s1090_s30 = sshll.u32 %s1720_s23, 2 }
   0xf   : > { %s1472_s29 = scalar_lea.vmem %s1714_s0, %s1088_s26  ;;  %s1576_s7 = scalar_lea.vmem %s1718_s4, %s1088_s26 }
  0x10   : > { %v215_v6 = vld [vmem:[%s1472_s29] sm:$0xff]  ;;  %v216_v7 = vld [vmem:[%s1472_s29 + $0x8] sm:$0xff]  ;;  %v217_v8 = vld [vmem:[%s1472_s29 + $0x10] sm:$0xff]  ;;  %s1581_s10 = scalar_lea.vmem %s1717_s3, %s1090_s30 }
  0x11   : > { %1295 = vmatprep.mubr.msk.f32.mxu0 %vm249_vm0, %v215_v6  ;;  %1347 = vmatprep.mubr.msk.f32.mxu1 %vm249_vm0, %v215_v6  ;;  %v218_v9 = vld [vmem:[%s1472_s29 + $0x18] sm:$0xff]  ;;  %v219_v10 = vld [vmem:[%s1472_s29 + $0x20] sm:$0xff]  ;;  %v220_v11 = vld [vmem:[%s1472_s29 + $0x28] sm:$0xff] }
  0x12   : > { %1296 = vmatmul.mubr.msk.f32.vlgmr.msra.gmra.mrb[0].mxu0 %vm249_vm0, %v216_v7  ;;  %1348 = vmatmul.mubr.msk.f32.vlgmr.msra.gmra.mrb[0].mxu1 %vm249_vm0, %v216_v7  ;;  %v221_v12 = vld [vmem:[%s1472_s29 + $0x30] sm:$0xff]  ;;  %v222_v13 = vld [vmem:[%s1472_s29 + $0x38] sm:$0xff]  ;;  %v223_v14 = vld [vmem:[%s1472_s29 + $0x40] sm:$0xff] }
  0x13   : > { %1298 = vmatprep.mubr.msk.f32.mxu0 %vm249_vm0, %v217_v8  ;;  %1350 = vmatprep.mubr.msk.f32.mxu1 %vm249_vm0, %v217_v8  ;;  %v224_v15 = vld [vmem:[%s1472_s29 + $0x48] sm:$0xff]  ;;  %v225_v16 = vld [vmem:[%s1472_s29 + $0x50] sm:$0xff]  ;;  %v226_v17 = vld [vmem:[%s1472_s29 + $0x58] sm:$0xff] }
  0x14   : > { %v227_v18 = vld [vmem:[%s1472_s29 + $0x60] sm:$0xff]  ;;  %v228_v19 = vld [vmem:[%s1472_s29 + $0x68] sm:$0xff]  ;;  %v229_v20 = vld [vmem:[%s1472_s29 + $0x70] sm:$0xff] }
  0x15   : > { %v230_v21 = vld [vmem:[%s1472_s29 + $0x78] sm:$0xff]  ;;  %v231_v22 = vld [vmem:[%s1472_s29 + $0x80] sm:$0xff]  ;;  %v232_v23 = vld [vmem:[%s1472_s29 + $0x88] sm:$0xff] }
  0x16   : > { %1299 = vmatmul.mubr.msk.f32.gmra.mrb[2].mxu0 %vm249_vm0, %v218_v9  ;;  %1351 = vmatmul.mubr.msk.f32.gmra.mrb[2].mxu1 %vm249_vm0, %v218_v9  ;;  %v233_v24 = vld [vmem:[%s1472_s29 + $0x90] sm:$0xff]  ;;  %v234_v25 = vld [vmem:[%s1472_s29 + $0x98] sm:$0xff]  ;;  %v235_v26 = vld [vmem:[%s1472_s29 + $0xa0] sm:$0xff] }
  0x17   : > { %1301 = vmatprep.mubr.msk.f32.mxu0 %vm249_vm0, %v219_v10  ;;  %1353 = vmatprep.mubr.msk.f32.mxu1 %vm249_vm0, %v219_v10  ;;  %v236_v27 = vld [vmem:[%s1472_s29 + $0xa8] sm:$0xff]  ;;  %v237_v28 = vld [vmem:[%s1472_s29 + $0xb0] sm:$0xff]  ;;  %v238_v29 = vld [vmem:[%s1472_s29 + $0xb8] sm:$0xff] }
  0x18   : > { %v239_v30 = vld [vmem:[%s1472_s29 + $0xc0] sm:$0xff]  ;;  %v240_v31 = vld [vmem:[%s1472_s29 + $0xc8] sm:$0xff]  ;;  %v241_v32 = vld [vmem:[%s1472_s29 + $0xd0] sm:$0xff] }
  0x19   : > { %v242_v33 = vld [vmem:[%s1472_s29 + $0xd8] sm:$0xff]  ;;  %v243_v34 = vld [vmem:[%s1472_s29 + $0xe0] sm:$0xff]  ;;  %v244_v35 = vld [vmem:[%s1472_s29 + $0xe8] sm:$0xff] }
  0x1a   : > { %1302 = vmatmul.mubr.msk.f32.gmra.mrb[4].mxu0 %vm249_vm0, %v220_v11  ;;  %1354 = vmatmul.mubr.msk.f32.gmra.mrb[4].mxu1 %vm249_vm0, %v220_v11  ;;  %v245_v36 = vld [vmem:[%s1472_s29 + $0xf0] sm:$0xff]  ;;  %v246_v37 = vld [vmem:[%s1472_s29 + $0xf8] sm:$0xff] }
  0x1b   : > { %1304 = vmatprep.mubr.msk.f32.mxu0 %vm249_vm0, %v221_v12  ;;  %1356 = vmatprep.mubr.msk.f32.mxu1 %vm249_vm0, %v221_v12 }
  0x1e   : > { %1305 = vmatmul.mubr.msk.f32.gmra.mrb[6].mxu0 %vm249_vm0, %v222_v13  ;;  %1357 = vmatmul.mubr.msk.f32.gmra.mrb[6].mxu1 %vm249_vm0, %v222_v13 }
  0x1f   : > { %1307 = vmatprep.mubr.msk.f32.mxu0 %vm249_vm0, %v223_v14  ;;  %1359 = vmatprep.mubr.msk.f32.mxu1 %vm249_vm0, %v223_v14 }
  0x22   : > { %1308 = vmatmul.mubr.msk.f32.gmra.mrb[8].mxu0 %vm249_vm0, %v224_v15  ;;  %1360 = vmatmul.mubr.msk.f32.gmra.mrb[8].mxu1 %vm249_vm0, %v224_v15 }
  0x23   : > { %1310 = vmatprep.mubr.msk.f32.mxu0 %vm249_vm0, %v225_v16  ;;  %1362 = vmatprep.mubr.msk.f32.mxu1 %vm249_vm0, %v225_v16 }
  0x26   : > { %1311 = vmatmul.mubr.msk.f32.gmra.mrb[10].mxu0 %vm249_vm0, %v226_v17  ;;  %1363 = vmatmul.mubr.msk.f32.gmra.mrb[10].mxu1 %vm249_vm0, %v226_v17 }
  0x27   : > { %1313 = vmatprep.mubr.msk.f32.mxu0 %vm249_vm0, %v227_v18  ;;  %1365 = vmatprep.mubr.msk.f32.mxu1 %vm249_vm0, %v227_v18 }
  0x2a   : > { %1314 = vmatmul.mubr.msk.f32.gmra.mrb[12].mxu0 %vm249_vm0, %v228_v19  ;;  %1366 = vmatmul.mubr.msk.f32.gmra.mrb[12].mxu1 %vm249_vm0, %v228_v19 }
  0x2b   : > { %1316 = vmatprep.mubr.msk.f32.mxu0 %vm249_vm0, %v229_v20  ;;  %1368 = vmatprep.mubr.msk.f32.mxu1 %vm249_vm0, %v229_v20 }
  0x2e   : > { %1317 = vmatmul.mubr.msk.f32.gmra.mrb[14].mxu0 %vm249_vm0, %v230_v21  ;;  %1369 = vmatmul.mubr.msk.f32.gmra.mrb[14].mxu1 %vm249_vm0, %v230_v21 }
  0x2f   : > { %1319 = vmatprep.mubr.msk.f32.mxu0 %vm249_vm0, %v231_v22  ;;  %1371 = vmatprep.mubr.msk.f32.mxu1 %vm249_vm0, %v231_v22 }
  0x32   : > { %1320 = vmatmul.mubr.msk.f32.gmra.mrb[16].mxu0 %vm249_vm0, %v232_v23  ;;  %1372 = vmatmul.mubr.msk.f32.gmra.mrb[16].mxu1 %vm249_vm0, %v232_v23 }
  0x33   : > { %1322 = vmatprep.mubr.msk.f32.mxu0 %vm249_vm0, %v233_v24  ;;  %1374 = vmatprep.mubr.msk.f32.mxu1 %vm249_vm0, %v233_v24 }
  0x36   : > { %1323 = vmatmul.mubr.msk.f32.gmra.mrb[18].mxu0 %vm249_vm0, %v234_v25  ;;  %1375 = vmatmul.mubr.msk.f32.gmra.mrb[18].mxu1 %vm249_vm0, %v234_v25 }
  0x37   : > { %1325 = vmatprep.mubr.msk.f32.mxu0 %vm249_vm0, %v235_v26  ;;  %1377 = vmatprep.mubr.msk.f32.mxu1 %vm249_vm0, %v235_v26 }
  0x3a   : > { %1326 = vmatmul.mubr.msk.f32.gmra.mrb[20].mxu0 %vm249_vm0, %v236_v27  ;;  %1378 = vmatmul.mubr.msk.f32.gmra.mrb[20].mxu1 %vm249_vm0, %v236_v27 }
  0x3b   : > { %1328 = vmatprep.mubr.msk.f32.mxu0 %vm249_vm0, %v237_v28  ;;  %1380 = vmatprep.mubr.msk.f32.mxu1 %vm249_vm0, %v237_v28 }
  0x3e   : > { %1329 = vmatmul.mubr.msk.f32.gmra.mrb[22].mxu0 %vm249_vm0, %v238_v29  ;;  %1381 = vmatmul.mubr.msk.f32.gmra.mrb[22].mxu1 %vm249_vm0, %v238_v29 }
  0x3f   : > { %1331 = vmatprep.mubr.msk.f32.mxu0 %vm249_vm0, %v239_v30  ;;  %1383 = vmatprep.mubr.msk.f32.mxu1 %vm249_vm0, %v239_v30 }
  0x42   : > { %1332 = vmatmul.mubr.msk.f32.gmra.mrb[24].mxu0 %vm249_vm0, %v240_v31  ;;  %1384 = vmatmul.mubr.msk.f32.gmra.mrb[24].mxu1 %vm249_vm0, %v240_v31 }
  0x43   : > { %1334 = vmatprep.mubr.msk.f32.mxu0 %vm249_vm0, %v241_v32  ;;  %1386 = vmatprep.mubr.msk.f32.mxu1 %vm249_vm0, %v241_v32 }
  0x46   : > { %1335 = vmatmul.mubr.msk.f32.gmra.mrb[26].mxu0 %vm249_vm0, %v242_v33  ;;  %1387 = vmatmul.mubr.msk.f32.gmra.mrb[26].mxu1 %vm249_vm0, %v242_v33 }
  0x47   : > { %1337 = vmatprep.mubr.msk.f32.mxu0 %vm249_vm0, %v243_v34  ;;  %1389 = vmatprep.mubr.msk.f32.mxu1 %vm249_vm0, %v243_v34 }
  0x4a   : > { %1338 = vmatmul.mubr.msk.f32.gmra.mrb[28].mxu0 %vm249_vm0, %v244_v35  ;;  %1390 = vmatmul.mubr.msk.f32.gmra.mrb[28].mxu1 %vm249_vm0, %v244_v35 }
  0x4b   : > { %1340 = vmatprep.mubr.msk.f32.mxu0 %vm249_vm0, %v245_v36  ;;  %1392 = vmatprep.mubr.msk.f32.mxu1 %vm249_vm0, %v245_v36 }
  0x4e   : > { %1341 = vmatmul.mubr.msk.f32.gmra.mrb[30].mxu0 %vm249_vm0, %v246_v37  ;;  %1393 = vmatmul.mubr.msk.f32.gmra.mrb[30].mxu1 %vm249_vm0, %v246_v37 }
  0xe5   : > { %v1297_v38 = vpop.f32.mrb[0].mxu0  ;;  %v1349_v39 = vpop.f32.mrb[0].mxu1 }
  0xe6   : > { %v1192_v40 = vpack.c.bf16 %v1297_v38, %v1297_v38  ;;  %v412_v41 = vpop.f32.mrb[1].mxu0  ;;  %961 = vst.msk [vmem:[%s1576_s7 + $0x8] sm:$0xff] %vm959_vm1, %v1349_v39  ;;  %v800_v42 = vpop.f32.mrb[1].mxu1 }
  0xe7   : > { %v1191_v43 = vpack.c.bf16 %v412_v41, %v412_v41  ;;  %960 = vst.msk [vmem:[%s1576_s7] sm:$0xff] %vm959_vm1, %v800_v42 }
  0xe8   : > { %701 = vst.msk [vmem:[%s1581_s10 + $0x4] sm:$0xf] %vm699_vm2, %v1192_v40 }
  0xe9   : > { %700 = vst.msk [vmem:[%s1581_s10] sm:$0xf] %vm699_vm2, %v1191_v43  ;;  %v1300_v44 = vpop.f32.mrb[2].mxu0  ;;  %v1352_v45 = vpop.f32.mrb[2].mxu1 }
  0xea   : > { %v1194_v46 = vpack.c.bf16 %v1300_v44, %v1300_v44  ;;  %v422_v47 = vpop.f32.mrb[3].mxu0  ;;  %963 = vst.msk [vmem:[%s1576_s7 + $0x18] sm:$0xff] %vm959_vm1, %v1352_v45  ;;  %v810_v48 = vpop.f32.mrb[3].mxu1 }
  0xeb   : > { %v1193_v49 = vpack.c.bf16 %v422_v47, %v422_v47  ;;  %962 = vst.msk [vmem:[%s1576_s7 + $0x10] sm:$0xff] %vm959_vm1, %v810_v48 }
  0xec   : > { %703 = vst.msk [vmem:[%s1581_s10 + $0xc] sm:$0xf] %vm699_vm2, %v1194_v46 }
  0xed   : > { %702 = vst.msk [vmem:[%s1581_s10 + $0x8] sm:$0xf] %vm699_vm2, %v1193_v49  ;;  %v1303_v50 = vpop.f32.mrb[4].mxu0  ;;  %v1355_v51 = vpop.f32.mrb[4].mxu1 }
  0xee   : > { %v1196_v52 = vpack.c.bf16 %v1303_v50, %v1303_v50  ;;  %v432_v53 = vpop.f32.mrb[5].mxu0  ;;  %965 = vst.msk [vmem:[%s1576_s7 + $0x28] sm:$0xff] %vm959_vm1, %v1355_v51  ;;  %v820_v54 = vpop.f32.mrb[5].mxu1 }
  0xef   : > { %v1195_v55 = vpack.c.bf16 %v432_v53, %v432_v53  ;;  %964 = vst.msk [vmem:[%s1576_s7 + $0x20] sm:$0xff] %vm959_vm1, %v820_v54 }
  0xf0   : > { %705 = vst.msk [vmem:[%s1581_s10 + $0x14] sm:$0xf] %vm699_vm2, %v1196_v52 }
  0xf1   : > { %704 = vst.msk [vmem:[%s1581_s10 + $0x10] sm:$0xf] %vm699_vm2, %v1195_v55  ;;  %v1306_v56 = vpop.f32.mrb[6].mxu0  ;;  %v1358_v57 = vpop.f32.mrb[6].mxu1 }
  0xf2   : > { %v1198_v58 = vpack.c.bf16 %v1306_v56, %v1306_v56  ;;  %v442_v59 = vpop.f32.mrb[7].mxu0  ;;  %967 = vst.msk [vmem:[%s1576_s7 + $0x38] sm:$0xff] %vm959_vm1, %v1358_v57  ;;  %v830_v60 = vpop.f32.mrb[7].mxu1 }
  0xf3   : > { %v1197_v61 = vpack.c.bf16 %v442_v59, %v442_v59  ;;  %966 = vst.msk [vmem:[%s1576_s7 + $0x30] sm:$0xff] %vm959_vm1, %v830_v60 }
  0xf4   : > { %707 = vst.msk [vmem:[%s1581_s10 + $0x1c] sm:$0xf] %vm699_vm2, %v1198_v58 }
  0xf5   : > { %706 = vst.msk [vmem:[%s1581_s10 + $0x18] sm:$0xf] %vm699_vm2, %v1197_v61  ;;  %v1309_v62 = vpop.f32.mrb[8].mxu0  ;;  %v1361_v63 = vpop.f32.mrb[8].mxu1 }
  0xf6   : > { %v1200_v0 = vpack.c.bf16 %v1309_v62, %v1309_v62  ;;  %v452_v1 = vpop.f32.mrb[9].mxu0  ;;  %969 = vst.msk [vmem:[%s1576_s7 + $0x48] sm:$0xff] %vm959_vm1, %v1361_v63  ;;  %v840_v2 = vpop.f32.mrb[9].mxu1 }
  0xf7   : > { %v1199_v3 = vpack.c.bf16 %v452_v1, %v452_v1  ;;  %968 = vst.msk [vmem:[%s1576_s7 + $0x40] sm:$0xff] %vm959_vm1, %v840_v2 }
  0xf8   : > { %709 = vst.msk [vmem:[%s1581_s10 + $0x24] sm:$0xf] %vm699_vm2, %v1200_v0 }
  0xf9   : > { %708 = vst.msk [vmem:[%s1581_s10 + $0x20] sm:$0xf] %vm699_vm2, %v1199_v3  ;;  %v1312_v4 = vpop.f32.mrb[10].mxu0  ;;  %v1364_v5 = vpop.f32.mrb[10].mxu1 }
  0xfa   : > { %v1202_v6 = vpack.c.bf16 %v1312_v4, %v1312_v4  ;;  %v462_v7 = vpop.f32.mrb[11].mxu0  ;;  %971 = vst.msk [vmem:[%s1576_s7 + $0x58] sm:$0xff] %vm959_vm1, %v1364_v5  ;;  %v850_v8 = vpop.f32.mrb[11].mxu1 }
  0xfb   : > { %v1201_v9 = vpack.c.bf16 %v462_v7, %v462_v7  ;;  %970 = vst.msk [vmem:[%s1576_s7 + $0x50] sm:$0xff] %vm959_vm1, %v850_v8 }
  0xfc   : > { %711 = vst.msk [vmem:[%s1581_s10 + $0x2c] sm:$0xf] %vm699_vm2, %v1202_v6 }
  0xfd   : > { %710 = vst.msk [vmem:[%s1581_s10 + $0x28] sm:$0xf] %vm699_vm2, %v1201_v9  ;;  %v1315_v10 = vpop.f32.mrb[12].mxu0  ;;  %v1367_v11 = vpop.f32.mrb[12].mxu1 }
  0xfe   : > { %v1204_v12 = vpack.c.bf16 %v1315_v10, %v1315_v10  ;;  %v472_v13 = vpop.f32.mrb[13].mxu0  ;;  %973 = vst.msk [vmem:[%s1576_s7 + $0x68] sm:$0xff] %vm959_vm1, %v1367_v11  ;;  %v860_v14 = vpop.f32.mrb[13].mxu1 }
  0xff   : > { %v1203_v15 = vpack.c.bf16 %v472_v13, %v472_v13  ;;  %972 = vst.msk [vmem:[%s1576_s7 + $0x60] sm:$0xff] %vm959_vm1, %v860_v14 }
 0x100   : > { %713 = vst.msk [vmem:[%s1581_s10 + $0x34] sm:$0xf] %vm699_vm2, %v1204_v12 }
 0x101   : > { %712 = vst.msk [vmem:[%s1581_s10 + $0x30] sm:$0xf] %vm699_vm2, %v1203_v15  ;;  %v1318_v16 = vpop.f32.mrb[14].mxu0  ;;  %v1370_v17 = vpop.f32.mrb[14].mxu1 }
 0x102   : > { %v1206_v18 = vpack.c.bf16 %v1318_v16, %v1318_v16  ;;  %v482_v19 = vpop.f32.mrb[15].mxu0  ;;  %975 = vst.msk [vmem:[%s1576_s7 + $0x78] sm:$0xff] %vm959_vm1, %v1370_v17  ;;  %v870_v20 = vpop.f32.mrb[15].mxu1 }
 0x103   : > { %v1205_v21 = vpack.c.bf16 %v482_v19, %v482_v19  ;;  %974 = vst.msk [vmem:[%s1576_s7 + $0x70] sm:$0xff] %vm959_vm1, %v870_v20 }
 0x104   : > { %715 = vst.msk [vmem:[%s1581_s10 + $0x3c] sm:$0xf] %vm699_vm2, %v1206_v18 }
 0x105   : > { %714 = vst.msk [vmem:[%s1581_s10 + $0x38] sm:$0xf] %vm699_vm2, %v1205_v21  ;;  %v1321_v22 = vpop.f32.mrb[16].mxu0  ;;  %v1373_v23 = vpop.f32.mrb[16].mxu1 }
 0x106   : > { %v1208_v24 = vpack.c.bf16 %v1321_v22, %v1321_v22  ;;  %v492_v25 = vpop.f32.mrb[17].mxu0  ;;  %977 = vst.msk [vmem:[%s1576_s7 + $0x88] sm:$0xff] %vm959_vm1, %v1373_v23  ;;  %v880_v26 = vpop.f32.mrb[17].mxu1 }
 0x107   : > { %v1207_v27 = vpack.c.bf16 %v492_v25, %v492_v25  ;;  %976 = vst.msk [vmem:[%s1576_s7 + $0x80] sm:$0xff] %vm959_vm1, %v880_v26 }
 0x108   : > { %717 = vst.msk [vmem:[%s1581_s10 + $0x44] sm:$0xf] %vm699_vm2, %v1208_v24 }
 0x109   : > { %716 = vst.msk [vmem:[%s1581_s10 + $0x40] sm:$0xf] %vm699_vm2, %v1207_v27  ;;  %v1324_v28 = vpop.f32.mrb[18].mxu0  ;;  %v1376_v29 = vpop.f32.mrb[18].mxu1 }
 0x10a   : > { %v1210_v30 = vpack.c.bf16 %v1324_v28, %v1324_v28  ;;  %v502_v31 = vpop.f32.mrb[19].mxu0  ;;  %979 = vst.msk [vmem:[%s1576_s7 + $0x98] sm:$0xff] %vm959_vm1, %v1376_v29  ;;  %v890_v32 = vpop.f32.mrb[19].mxu1 }
 0x10b   : > { %v1209_v33 = vpack.c.bf16 %v502_v31, %v502_v31  ;;  %978 = vst.msk [vmem:[%s1576_s7 + $0x90] sm:$0xff] %vm959_vm1, %v890_v32 }
 0x10c   : > { %719 = vst.msk [vmem:[%s1581_s10 + $0x4c] sm:$0xf] %vm699_vm2, %v1210_v30 }
 0x10d   : > { %718 = vst.msk [vmem:[%s1581_s10 + $0x48] sm:$0xf] %vm699_vm2, %v1209_v33  ;;  %v1327_v34 = vpop.f32.mrb[20].mxu0  ;;  %v1379_v35 = vpop.f32.mrb[20].mxu1 }
 0x10e   : > { %v1212_v36 = vpack.c.bf16 %v1327_v34, %v1327_v34  ;;  %v512_v37 = vpop.f32.mrb[21].mxu0  ;;  %981 = vst.msk [vmem:[%s1576_s7 + $0xa8] sm:$0xff] %vm959_vm1, %v1379_v35  ;;  %v900_v38 = vpop.f32.mrb[21].mxu1 }
 0x10f   : > { %v1211_v39 = vpack.c.bf16 %v512_v37, %v512_v37  ;;  %980 = vst.msk [vmem:[%s1576_s7 + $0xa0] sm:$0xff] %vm959_vm1, %v900_v38 }
 0x110   : > { %721 = vst.msk [vmem:[%s1581_s10 + $0x54] sm:$0xf] %vm699_vm2, %v1212_v36 }
 0x111   : > { %720 = vst.msk [vmem:[%s1581_s10 + $0x50] sm:$0xf] %vm699_vm2, %v1211_v39  ;;  %v1330_v40 = vpop.f32.mrb[22].mxu0  ;;  %v1382_v41 = vpop.f32.mrb[22].mxu1 }
 0x112   : > { %v1214_v42 = vpack.c.bf16 %v1330_v40, %v1330_v40  ;;  %v522_v43 = vpop.f32.mrb[23].mxu0  ;;  %983 = vst.msk [vmem:[%s1576_s7 + $0xb8] sm:$0xff] %vm959_vm1, %v1382_v41  ;;  %v910_v44 = vpop.f32.mrb[23].mxu1 }
 0x113   : > { %v1213_v45 = vpack.c.bf16 %v522_v43, %v522_v43  ;;  %982 = vst.msk [vmem:[%s1576_s7 + $0xb0] sm:$0xff] %vm959_vm1, %v910_v44 }
 0x114   : > { %723 = vst.msk [vmem:[%s1581_s10 + $0x5c] sm:$0xf] %vm699_vm2, %v1214_v42 }
 0x115   : > { %722 = vst.msk [vmem:[%s1581_s10 + $0x58] sm:$0xf] %vm699_vm2, %v1213_v45  ;;  %v1333_v46 = vpop.f32.mrb[24].mxu0  ;;  %v1385_v47 = vpop.f32.mrb[24].mxu1 }
 0x116   : > { %v1216_v48 = vpack.c.bf16 %v1333_v46, %v1333_v46  ;;  %v532_v49 = vpop.f32.mrb[25].mxu0  ;;  %985 = vst.msk [vmem:[%s1576_s7 + $0xc8] sm:$0xff] %vm959_vm1, %v1385_v47  ;;  %v920_v50 = vpop.f32.mrb[25].mxu1 }
 0x117   : > { %v1215_v51 = vpack.c.bf16 %v532_v49, %v532_v49  ;;  %984 = vst.msk [vmem:[%s1576_s7 + $0xc0] sm:$0xff] %vm959_vm1, %v920_v50 }
 0x118   : > { %725 = vst.msk [vmem:[%s1581_s10 + $0x64] sm:$0xf] %vm699_vm2, %v1216_v48 }
 0x119   : > { %724 = vst.msk [vmem:[%s1581_s10 + $0x60] sm:$0xf] %vm699_vm2, %v1215_v51  ;;  %v1336_v52 = vpop.f32.mrb[26].mxu0  ;;  %v1388_v53 = vpop.f32.mrb[26].mxu1 }
 0x11a   : > { %v1218_v54 = vpack.c.bf16 %v1336_v52, %v1336_v52  ;;  %v542_v55 = vpop.f32.mrb[27].mxu0  ;;  %987 = vst.msk [vmem:[%s1576_s7 + $0xd8] sm:$0xff] %vm959_vm1, %v1388_v53  ;;  %v930_v56 = vpop.f32.mrb[27].mxu1 }
 0x11b   : > { %v1217_v57 = vpack.c.bf16 %v542_v55, %v542_v55  ;;  %986 = vst.msk [vmem:[%s1576_s7 + $0xd0] sm:$0xff] %vm959_vm1, %v930_v56 }
 0x11c   : > { %727 = vst.msk [vmem:[%s1581_s10 + $0x6c] sm:$0xf] %vm699_vm2, %v1218_v54 }
 0x11d   : > { %726 = vst.msk [vmem:[%s1581_s10 + $0x68] sm:$0xf] %vm699_vm2, %v1217_v57  ;;  %v1339_v58 = vpop.f32.mrb[28].mxu0  ;;  %v1391_v59 = vpop.f32.mrb[28].mxu1 }
 0x11e   : > { %v1220_v60 = vpack.c.bf16 %v1339_v58, %v1339_v58  ;;  %v552_v61 = vpop.f32.mrb[29].mxu0  ;;  %989 = vst.msk [vmem:[%s1576_s7 + $0xe8] sm:$0xff] %vm959_vm1, %v1391_v59  ;;  %v940_v62 = vpop.f32.mrb[29].mxu1 }
 0x11f   : > { %v1219_v63 = vpack.c.bf16 %v552_v61, %v552_v61  ;;  %988 = vst.msk [vmem:[%s1576_s7 + $0xe0] sm:$0xff] %vm959_vm1, %v940_v62 }
 0x120   : > { %729 = vst.msk [vmem:[%s1581_s10 + $0x74] sm:$0xf] %vm699_vm2, %v1220_v60 }
 0x121   : > { %728 = vst.msk [vmem:[%s1581_s10 + $0x70] sm:$0xf] %vm699_vm2, %v1219_v63  ;;  %v1342_v0 = vpop.f32.mrb[30].mxu0  ;;  %v1394_v1 = vpop.f32.mrb[30].mxu1 }
 0x122   : > { %v1222_v2 = vpack.c.bf16 %v1342_v0, %v1342_v0  ;;  %v562_v3 = vpop.f32.mrb[31].mxu0  ;;  %991 = vst.msk [vmem:[%s1576_s7 + $0xf8] sm:$0xff] %vm959_vm1, %v1394_v1  ;;  %v950_v4 = vpop.f32.mrb[31].mxu1 }
 0x123   : > { %v1221_v5 = vpack.c.bf16 %v562_v3, %v562_v3  ;;  %990 = vst.msk [vmem:[%s1576_s7 + $0xf0] sm:$0xff] %vm959_vm1, %v950_v4 }
 0x124   : > { %731 = vst.msk [vmem:[%s1581_s10 + $0x7c] sm:$0xf] %vm699_vm2, %v1222_v2 }
 0x125   : > { %730 = vst.msk [vmem:[%s1581_s10 + $0x78] sm:$0xf] %vm699_vm2, %v1221_v5 }
 0x126 PF: > { %s15_s15 = sadd.s32 1, %s1417_s15  }
 0x127   : > { %p12_p4 = scmp.ge.s32.totalorder %s15_s15, 4  }
 0x129   :  { %14 = sbr.rel (!%p12_p4) target bundleno = 1 (0x1), region = 74 }

</bundles_post_ra>
